<compile_context>
chip_gen: v6e
topology: v6e:2x2x1
jax: 0.10.0
libtpu: 0.0.40
codegen_flags: <defaults>
</compile_context>

<pallas_src>
import functools
import math

import jax
import jax.numpy as jnp
from jax.experimental import pallas as pl
from jax.experimental.pallas import tpu as pltpu


def _round_up(a, b):
    return (a + b - 1) // b * b


def _softplus(z):
    # numerically-stable softplus, matches F.softplus default (beta=1)
    return jnp.maximum(z, 0.0) + jnp.log1p(jnp.exp(-jnp.abs(z)))


# ----------------------------------------------------------------------------
# Kernels
# ----------------------------------------------------------------------------
def _fused_dist_kernel(x_ref, w_ref, b_ref, minlv_ref, maxlv_ref,
                       out_ref, acc_ref, *, n_mu_tiles):
    """Fused [mu | logvar] projection with soft-clamp on the logvar half."""
    j = pl.program_id(1)                 # N tile index
    k = pl.program_id(2)                 # K (reduction) tile index
    last_k = pl.num_programs(2) - 1

    @pl.when(k == 0)
    def _():
        acc_ref[...] = jnp.zeros_like(acc_ref)

    # bf16 x bf16 -> f32 accumulate on the MXU
    acc_ref[...] += jnp.dot(x_ref[...], w_ref[...],
                            preferred_element_type=jnp.float32)

    # Epilogue for mu tiles: plain bias add.
    @pl.when((k == last_k) & (j < n_mu_tiles))
    def _():
        out_ref[...] = (acc_ref[...] + b_ref[...]).astype(out_ref.dtype)

    # Epilogue for logvar tiles: bias add + soft clamp to [min_logvar, max_logvar].
    @pl.when((k == last_k) & (j >= n_mu_tiles))
    def _():
        lv = acc_ref[...] + b_ref[...]
        max_lv = maxlv_ref[...]
        min_lv = minlv_ref[...]
        lv = max_lv - _softplus(max_lv - lv)
        lv = min_lv + _softplus(lv - min_lv)
        out_ref[...] = lv.astype(out_ref.dtype)


def _mu_kernel(x_ref, w_ref, b_ref, out_ref, acc_ref):
    """Single linear projection ('mse' path)."""
    k = pl.program_id(2)
    last_k = pl.num_programs(2) - 1

    @pl.when(k == 0)
    def _():
        acc_ref[...] = jnp.zeros_like(acc_ref)

    acc_ref[...] += jnp.dot(x_ref[...], w_ref[...],
                            preferred_element_type=jnp.float32)

    @pl.when(k == last_k)
    def _():
        out_ref[...] = (acc_ref[...] + b_ref[...]).astype(out_ref.dtype)


# ----------------------------------------------------------------------------
# pallas_call wrappers
# ----------------------------------------------------------------------------
def _choose_tiles(B, D_in, D_out):
    tm = min(256, _round_up(B, 8))                 # batch tile (sublane-aligned)
    tn = 128 if D_out <= 128 else 256              # lane-dense output tile
    tk = min(256, _round_up(D_in, 128))            # reduction tile
    return tm, tn, tk


def _compiler_params(tm, tn, tk):
    # Per-step VMEM: double-buffered bf16 x/w tiles + f32 rows/output + f32 acc.
    need = 2 * (tm * tk * 2 + tk * tn * 2 + 3 * tn * 4 + tm * tn * 4) + tm * tn * 4
    return pltpu.CompilerParams(
        dimension_semantics=("parallel", "parallel", "arbitrary"),
        vmem_limit_bytes=int(min(max(4 * need, 4 << 20), 32 << 20)),
    )


def _fused_matmul_call(xp, w_cat, b_cat, minlv_cat, maxlv_cat,
                       n_mu_tiles, tm, tn, tk):
    Bp, Kp = xp.shape
    Np = w_cat.shape[1]
    grid = (Bp // tm, Np // tn, Kp // tk)
    return pl.pallas_call(
        functools.partial(_fused_dist_kernel, n_mu_tiles=n_mu_tiles),
        out_shape=jax.ShapeDtypeStruct((Bp, Np), jnp.float32),
        grid_spec=pltpu.PrefetchScalarGridSpec(
            num_scalar_prefetch=0,
            grid=grid,
            in_specs=[
                pl.BlockSpec((tm, tk), lambda i, j, k: (i, k)),   # x
                pl.BlockSpec((tk, tn), lambda i, j, k: (k, j)),   # [W_mu | W_std]
                pl.BlockSpec((1, tn), lambda i, j, k: (0, j)),    # bias
                pl.BlockSpec((1, tn), lambda i, j, k: (0, j)),    # min_logvar
                pl.BlockSpec((1, tn), lambda i, j, k: (0, j)),    # max_logvar
            ],
            out_specs=pl.BlockSpec((tm, tn), lambda i, j, k: (i, j)),
            scratch_shapes=[pltpu.VMEM((tm, tn), jnp.float32)],
        ),
        compiler_params=_compiler_params(tm, tn, tk),
    )(xp, w_cat, b_cat, minlv_cat, maxlv_cat)


def _mu_matmul_call(xp, w_p, b_p, tm, tn, tk):
    Bp, Kp = xp.shape
    Np = w_p.shape[1]
    grid = (Bp // tm, Np // tn, Kp // tk)
    return pl.pallas_call(
        _mu_kernel,
        out_shape=jax.ShapeDtypeStruct((Bp, Np), jnp.float32),
        grid_spec=pltpu.PrefetchScalarGridSpec(
            num_scalar_prefetch=0,
            grid=grid,
            in_specs=[
                pl.BlockSpec((tm, tk), lambda i, j, k: (i, k)),
                pl.BlockSpec((tk, tn), lambda i, j, k: (k, j)),
                pl.BlockSpec((1, tn), lambda i, j, k: (0, j)),
            ],
            out_specs=pl.BlockSpec((tm, tn), lambda i, j, k: (i, j)),
            scratch_shapes=[pltpu.VMEM((tm, tn), jnp.float32)],
        ),
        compiler_params=_compiler_params(tm, tn, tk),
    )(xp, w_p, b_p)


# ----------------------------------------------------------------------------
# Parameters & forward
# ----------------------------------------------------------------------------
def make_dist_layer_params(key, input_shape, output_shape, dist):
    """nn.Linear-style init (uniform +-1/sqrt(fan_in)); weights stored (D_in, D_out)."""
    kmw, kmb, ksw, ksb = jax.random.split(key, 4)
    bound = 1.0 / math.sqrt(input_shape)
    params = {
        "w_mu": jax.random.uniform(kmw, (input_shape, output_shape),
                                   jnp.float32, -bound, bound),
        "b_mu": jax.random.uniform(kmb, (1, output_shape),
                                   jnp.float32, -bound, bound),
    }
    if dist in ("normal", "trunc_normal"):
        params.update({
            "w_std": jax.random.uniform(ksw, (input_shape, output_shape),
                                        jnp.float32, -bound, bound),
            "b_std": jax.random.uniform(ksb, (1, output_shape),
                                        jnp.float32, -bound, bound),
            "min_logvar": jnp.full((1, output_shape), -10.0, jnp.float32),
            "max_logvar": jnp.full((1, output_shape), 0.5, jnp.float32),
        })
    return params


@functools.partial(jax.jit, static_argnames=("dist", "moments"))
def dist_layer_forward(x, params, dist="normal", moments=True):
    """DistLayer forward.

    'normal'/'trunc_normal' -> (mu, logvar); 'mse' -> (mu, 1.0).
    """
    B, D_in = x.shape
    D_out = params["w_mu"].shape[1]
    tm, tn, tk = _choose_tiles(B, D_in, D_out)
    Bp = _round_up(B, tm)
    Kp = _round_up(D_in, tk)
    Dp = _round_up(D_out, tn)

    xp = jnp.pad(x, ((0, Bp - B), (0, Kp - D_in))).astype(jnp.bfloat16)

    def pad_w(w):   # (D_in, D_out) -> (Kp, Dp) bf16
        return jnp.pad(w, ((0, Kp - D_in), (0, Dp - D_out))).astype(jnp.bfloat16)

    def pad_row(r):  # (1, D_out) -> (1, Dp) f32
        return jnp.pad(r, ((0, 0), (0, Dp - D_out))).astype(jnp.float32)

    if dist == "mse":
        out = _mu_matmul_call(xp, pad_w(params["w_mu"]), pad_row(params["b_mu"]),
                              tm, tn, tk)
        return out[:B, :D_out], 1.0

    if dist in ("normal", "trunc_normal"):
        # Fuse the two projections: [W_mu | W_std] along the (padded) output dim.
        w_cat = jnp.concatenate([pad_w(params["w_mu"]), pad_w(params["w_std"])], axis=1)
        b_cat = jnp.concatenate([pad_row(params["b_mu"]), pad_row(params["b_std"])], axis=1)
        zeros_row = jnp.zeros((1, Dp), jnp.float32)
        minlv_cat = jnp.concatenate([zeros_row, pad_row(params["min_logvar"])], axis=1)
        maxlv_cat = jnp.concatenate([zeros_row, pad_row(params["max_logvar"])], axis=1)

        out = _fused_matmul_call(xp, w_cat, b_cat, minlv_cat, maxlv_cat,
                                 Dp // tn, tm, tn, tk)
        mu = out[:B, :D_out]
        logvar = out[:B, Dp:Dp + D_out]
        # moments=False would wrap these in Normal / SquashedNormal(mu, sqrt(exp(logvar)));
        # distribution objects have no Pallas equivalent, so the moments are returned.
        # TODO(synk): torch.distributions Normal/SquashedNormal (sampling/log_prob) not kernelized.
        return mu, logvar

    raise NotImplementedError(
        f"dist={dist!r} not supported ('normal_var_adjust' is incomplete in the reference module)")


# ----------------------------------------------------------------------------
# Plain-JAX reference (same bf16 matmul operands / f32 accumulation)
# ----------------------------------------------------------------------------
def _reference_forward(x, params, dist="normal"):
    xb = x.astype(jnp.bfloat16)
    mu = jnp.dot(xb, params["w_mu"].astype(jnp.bfloat16),
                 preferred_element_type=jnp.float32) + params["b_mu"]
    if dist == "mse":
        return mu, 1.0
    lv = jnp.dot(xb, params["w_std"].astype(jnp.bfloat16),
                 preferred_element_type=jnp.float32) + params["b_std"]
    lv = params["max_logvar"] - jax.nn.softplus(params["max_logvar"] - lv)
    lv = params["min_logvar"] + jax.nn.softplus(lv - params["min_logvar"])
    return mu, lv


if __name__ == "__main__":
    key = jax.random.PRNGKey(0)
    kx, kp, kx2, kp2 = jax.random.split(key, 4)

    # Small shapes matching the module's typical use.
    B, D_in, D_out = 8, 32, 16
    x = jax.random.normal(kx, (B, D_in), jnp.float32)
    params = make_dist_layer_params(kp, D_in, D_out, dist="normal")

    mu, logvar = dist_layer_forward(x, params, dist="normal", moments=True)
    jax.block_until_ready((mu, logvar))

    mu_ref, lv_ref = _reference_forward(x, params, dist="normal")
    assert jnp.allclose(mu, mu_ref, atol=1e-4, rtol=1e-4)
    assert jnp.allclose(logvar, lv_ref, atol=1e-4, rtol=1e-4)

    # 'mse' path
    mu2, _ = dist_layer_forward(x, params, dist="mse", moments=True)
    jax.block_until_ready(mu2)
    mu2_ref, _ = _reference_forward(x, params, dist="mse")
    assert jnp.allclose(mu2, mu2_ref, atol=1e-4, rtol=1e-4)

    # Slightly larger shape to exercise multi-tile K accumulation and multiple N tiles.
    B2, D_in2, D_out2 = 16, 300, 96
    x2 = jax.random.normal(kx2, (B2, D_in2), jnp.float32)
    params2 = make_dist_layer_params(kp2, D_in2, D_out2, dist="trunc_normal")
    mu3, lv3 = dist_layer_forward(x2, params2, dist="trunc_normal", moments=True)
    jax.block_until_ready((mu3, lv3))
    mu3_ref, lv3_ref = _reference_forward(x2, params2, dist="trunc_normal")
    assert jnp.allclose(mu3, mu3_ref, atol=1e-3, rtol=1e-3)
    assert jnp.allclose(lv3, lv3_ref, atol=1e-3, rtol=1e-3)

    print("KERNEL_OK")
</pallas_src>

<mosaic_0001>
module attributes {stable_mosaic.version = 11 : i64} {
  func.func @_fused_dist_kernel(%arg0: i32, %arg1: i32, %arg2: i32, %arg3: memref<8x128xbf16, #tpu.memory_space<vmem>>, %arg4: memref<128x128xbf16, #tpu.memory_space<vmem>>, %arg5: memref<1x128xf32, #tpu.memory_space<vmem>>, %arg6: memref<1x128xf32, #tpu.memory_space<vmem>>, %arg7: memref<1x128xf32, #tpu.memory_space<vmem>>, %arg8: memref<8x128xf32, #tpu.memory_space<vmem>>, %arg9: memref<8x128xf32, #tpu.memory_space<vmem>>) attributes {dimension_semantics = [#tpu.dimension_semantics<parallel>, #tpu.dimension_semantics<parallel>, #tpu.dimension_semantics<arbitrary>], iteration_bounds = array<i64: 1, 2, 1>, scalar_prefetch = 0 : i64, scratch_operands = 1 : i64, tpu.core_type = #tpu.core_type<tc>, window_params = [{transform_indices = @transform_0, window_bounds = array<i64: 8, 128>}, {transform_indices = @transform_1, window_bounds = array<i64: 128, 128>}, {transform_indices = @transform_2, window_bounds = array<i64: 1, 128>}, {transform_indices = @transform_3, window_bounds = array<i64: 1, 128>}, {transform_indices = @transform_4, window_bounds = array<i64: 1, 128>}, {transform_indices = @transform_5, window_bounds = array<i64: 8, 128>}]} {
    %c0_i32 = arith.constant 0 : i32
    %0 = arith.cmpi eq, %arg2, %c0_i32 : i32
    %1 = arith.extui %0 : i1 to i32
    %c0_i32_0 = arith.constant 0 : i32
    %2 = arith.cmpi ne, %1, %c0_i32_0 : i32
    scf.if %2 {
      %cst_13 = arith.constant 0.000000e+00 : f32
      %19 = vector.broadcast %cst_13 : f32 to vector<8x128xf32>
      %c0_14 = arith.constant 0 : index
      %c0_15 = arith.constant 0 : index
      %20 = vector.load %arg9[%c0_14, %c0_15] : memref<8x128xf32, #tpu.memory_space<vmem>>, vector<8x128xf32>
      tpu.vector_store %arg9[%c0_14, %c0_15], %19 {strides = array<i32>} : memref<8x128xf32, #tpu.memory_space<vmem>>, vector<8x128xf32>,
    } else {
    }
    %c0 = arith.constant 0 : index
    %c0_1 = arith.constant 0 : index
    %3 = vector.load %arg9[%c0, %c0_1] : memref<8x128xf32, #tpu.memory_space<vmem>>, vector<8x128xf32>
    %c0_2 = arith.constant 0 : index
    %c0_3 = arith.constant 0 : index
    %4 = vector.load %arg3[%c0_2, %c0_3] : memref<8x128xbf16, #tpu.memory_space<vmem>>, vector<8x128xbf16>
    %c0_4 = arith.constant 0 : index
    %c0_5 = arith.constant 0 : index
    %5 = vector.load %arg4[%c0_4, %c0_5] : memref<128x128xbf16, #tpu.memory_space<vmem>>, vector<128x128xbf16>
    %cst = arith.constant dense<0.000000e+00> : vector<8x128xf32>
    %6 = tpu.matmul %4, %5, %cst {dimension_numbers = #tpu.dot_dimension_numbers<[1], [0], [0], [1], [0, 0, 1, 1], [], []>} : vector<8x128xbf16>, vector<128x128xbf16>, vector<8x128xf32> -> vector<8x128xf32>
    %7 = arith.addf %3, %6 : vector<8x128xf32>
    %c0_6 = arith.constant 0 : index
    %c0_7 = arith.constant 0 : index
    %8 = vector.load %arg9[%c0_6, %c0_7] : memref<8x128xf32, #tpu.memory_space<vmem>>, vector<8x128xf32>
    tpu.vector_store %arg9[%c0_6, %c0_7], %7 {strides = array<i32>} : memref<8x128xf32, #tpu.memory_space<vmem>>, vector<8x128xf32>,
    %c0_i32_8 = arith.constant 0 : i32
    %9 = arith.cmpi eq, %arg2, %c0_i32_8 : i32
    %c1_i32 = arith.constant 1 : i32
    %10 = arith.cmpi slt, %arg1, %c1_i32 : i32
    %11 = arith.andi %9, %10 : i1
    %12 = arith.extui %11 : i1 to i32
    %c0_i32_9 = arith.constant 0 : i32
    %13 = arith.cmpi ne, %12, %c0_i32_9 : i32
    scf.if %13 {
      %c0_13 = arith.constant 0 : index
      %c0_14 = arith.constant 0 : index
      %19 = vector.load %arg9[%c0_13, %c0_14] : memref<8x128xf32, #tpu.memory_space<vmem>>, vector<8x128xf32>
      %c0_15 = arith.constant 0 : index
      %c0_16 = arith.constant 0 : index
      %20 = vector.load %arg5[%c0_15, %c0_16] : memref<1x128xf32, #tpu.memory_space<vmem>>, vector<1x128xf32>
      %21 = vector.broadcast %20 : vector<1x128xf32> to vector<8x128xf32>
      %22 = arith.addf %19, %21 : vector<8x128xf32>
      %c0_17 = arith.constant 0 : index
      %c0_18 = arith.constant 0 : index
      %23 = vector.load %arg8[%c0_17, %c0_18] : memref<8x128xf32, #tpu.memory_space<vmem>>, vector<8x128xf32>
      tpu.vector_store %arg8[%c0_17, %c0_18], %22 {strides = array<i32>} : memref<8x128xf32, #tpu.memory_space<vmem>>, vector<8x128xf32>,
    } else {
    }
    %c0_i32_10 = arith.constant 0 : i32
    %14 = arith.cmpi eq, %arg2, %c0_i32_10 : i32
    %c1_i32_11 = arith.constant 1 : i32
    %15 = arith.cmpi sge, %arg1, %c1_i32_11 : i32
    %16 = arith.andi %14, %15 : i1
    %17 = arith.extui %16 : i1 to i32
    %c0_i32_12 = arith.constant 0 : i32
    %18 = arith.cmpi ne, %17, %c0_i32_12 : i32
    scf.if %18 {
      %c0_13 = arith.constant 0 : index
      %c0_14 = arith.constant 0 : index
      %19 = vector.load %arg9[%c0_13, %c0_14] : memref<8x128xf32, #tpu.memory_space<vmem>>, vector<8x128xf32>
      %c0_15 = arith.constant 0 : index
      %c0_16 = arith.constant 0 : index
      %20 = vector.load %arg5[%c0_15, %c0_16] : memref<1x128xf32, #tpu.memory_space<vmem>>, vector<1x128xf32>
      %21 = vector.broadcast %20 : vector<1x128xf32> to vector<8x128xf32>
      %22 = arith.addf %19, %21 : vector<8x128xf32>
      %c0_17 = arith.constant 0 : index
      %c0_18 = arith.constant 0 : index
      %23 = vector.load %arg7[%c0_17, %c0_18] : memref<1x128xf32, #tpu.memory_space<vmem>>, vector<1x128xf32>
      %c0_19 = arith.constant 0 : index
      %c0_20 = arith.constant 0 : index
      %24 = vector.load %arg6[%c0_19, %c0_20] : memref<1x128xf32, #tpu.memory_space<vmem>>, vector<1x128xf32>
      %25 = vector.broadcast %23 : vector<1x128xf32> to vector<8x128xf32>
      %26 = arith.subf %25, %22 : vector<8x128xf32>
      %cst_21 = arith.constant 0.000000e+00 : f32
      %27 = vector.broadcast %cst_21 : f32 to vector<8x128xf32>
      %28 = arith.maximumf %26, %27 : vector<8x128xf32>
      %29 = math.absf %26 : vector<8x128xf32>
      %cst_22 = arith.constant 0.000000e+00 : f32
      %30 = vector.broadcast %cst_22 : f32 to vector<8x128xf32>
      %31 = arith.subf %30, %29 : vector<8x128xf32>
      %32 = math.exp %31 : vector<8x128xf32>
      %33 = math.log1p %32 : vector<8x128xf32>
      %34 = arith.addf %28, %33 : vector<8x128xf32>
      %35 = vector.broadcast %23 : vector<1x128xf32> to vector<8x128xf32>
      %36 = arith.subf %35, %34 : vector<8x128xf32>
      %37 = vector.broadcast %24 : vector<1x128xf32> to vector<8x128xf32>
      %38 = arith.subf %36, %37 : vector<8x128xf32>
      %cst_23 = arith.constant 0.000000e+00 : f32
      %39 = vector.broadcast %cst_23 : f32 to vector<8x128xf32>
      %40 = arith.maximumf %38, %39 : vector<8x128xf32>
      %41 = math.absf %38 : vector<8x128xf32>
      %cst_24 = arith.constant 0.000000e+00 : f32
      %42 = vector.broadcast %cst_24 : f32 to vector<8x128xf32>
      %43 = arith.subf %42, %41 : vector<8x128xf32>
      %44 = math.exp %43 : vector<8x128xf32>
      %45 = math.log1p %44 : vector<8x128xf32>
      %46 = arith.addf %40, %45 : vector<8x128xf32>
      %47 = vector.broadcast %24 : vector<1x128xf32> to vector<8x128xf32>
      %48 = arith.addf %47, %46 : vector<8x128xf32>
      %c0_25 = arith.constant 0 : index
      %c0_26 = arith.constant 0 : index
      %49 = vector.load %arg8[%c0_25, %c0_26] : memref<8x128xf32, #tpu.memory_space<vmem>>, vector<8x128xf32>
      tpu.vector_store %arg8[%c0_25, %c0_26], %48 {strides = array<i32>} : memref<8x128xf32, #tpu.memory_space<vmem>>, vector<8x128xf32>,
    } else {
    }
    return
  }
  func.func @transform_0(%arg0: i32, %arg1: i32, %arg2: i32) -> (i32, i32) {
    %c0_i32 = arith.constant 0 : i32
    return %arg0, %arg2 : i32, i32
  }
  func.func @transform_1(%arg0: i32, %arg1: i32, %arg2: i32) -> (i32, i32) {
    %c0_i32 = arith.constant 0 : i32
    return %arg2, %arg1 : i32, i32
  }
  func.func @transform_2(%arg0: i32, %arg1: i32, %arg2: i32) -> (i32, i32) {
    %c0_i32 = arith.constant 0 : i32
    %c0_i32_0 = arith.constant 0 : i32
    return %c0_i32, %arg1 : i32, i32
  }
  func.func @transform_3(%arg0: i32, %arg1: i32, %arg2: i32) -> (i32, i32) {
    %c0_i32 = arith.constant 0 : i32
    %c0_i32_0 = arith.constant 0 : i32
    return %c0_i32, %arg1 : i32, i32
  }
  func.func @transform_4(%arg0: i32, %arg1: i32, %arg2: i32) -> (i32, i32) {
    %c0_i32 = arith.constant 0 : i32
    %c0_i32_0 = arith.constant 0 : i32
    return %c0_i32, %arg1 : i32, i32
  }
  func.func @transform_5(%arg0: i32, %arg1: i32, %arg2: i32) -> (i32, i32) {
    %c0_i32 = arith.constant 0 : i32
    return %arg0, %arg1 : i32, i32
  }
}

</mosaic_0001>

<bundles_post_ra>
// kernel: dist_layer_forward.1
= control target key start
LH: loop header
LB: loop body
LE: loop exit
PB: predicated region body
PF: predicated region fallthrough
CT: control target
= control target key end

     0   :  { %s944_s18 = smov 0   ;;  %s946_s19 = smov 0   ;;  %s1069_s0 = inlined_call_operand.vmem [shape: bf16[8,128], index: 0, kind: input, shape index: {}]   ;;  %s1070_s1 = inlined_call_operand.vmem [shape: bf16[128,256], index: 1, kind: input, shape index: {}]   ;;  %s1071_s2 = inlined_call_operand.vmem [shape: f32[1,256], index: 2, kind: input, shape index: {}]   ;;  %s1072_s3 = inlined_call_operand.vmem [shape: f32[1,256], index: 3, kind: input, shape index: {}]   ;;  %s1073_s4 = inlined_call_operand.vmem [shape: f32[1,256], index: 4, kind: input, shape index: {}]   ;;  %s1074_s5 = inlined_call_operand.vmem [shape: f32[8,256], index: 5, kind: output, shape index: {}]  }
   0x1   :  { %s948_s20 = smov 0   ;;  %s950_s21 = smov 0  }
   0x2   :  { %s952_s22 = smov 0  }
   0x3 LB: > { %s30_s23 = sadd.s32 1, %s906_s21  ;;  %p78_p1 = scmp.ne.s32.totalorder %s898_s19, %s894_s18  ;;  %s910_s22 = sphi %s952_s22, %s15_s22   ;;  %s906_s21 = sphi %s950_s21, %s1078_s21   ;;  %s902_s20 = sphi %s948_s20, %s1077_s20   ;;  %s898_s19 = sphi %s946_s19, %s1076_s19   ;;  %s894_s18 = sphi %s944_s18, %s1075_s18  }
   0x4   : > { %p32_p0 = scmp.ge.s32.totalorder %s30_s23, 2  ;;  %p79_p2 = scmp.eq.s32.totalorder %s910_s22, 0 }
   0x5   : > { %s71_s25 = sadd.s32 1, %s898_s19  ;;  %p761_p5 = scmp.ge.s32.totalorder %s910_s22, 2 }
   0x6   : > { %s1080_s23 = smov (%p32_p0, %s30_s23), 0  ;;  %p80_p3 = por %p79_p2, %p78_p1 }
   0x7   : > { %s67_s24 = ssub.s32 %s906_s21, %s1080_s23  ;;  %220 = sbr.rel (%p761_p5) target bundleno = 26 (0x1a), region = 20 }
   0x8   : > { %p69_p4 = scmp.eq.s32.totalorder %s67_s24, 0 }
   0xa   : > { %s979_s26 = scalar_select %p69_p4, %s898_s19, %s71_s25  }
   0xc   : > { %223 = sbr.rel (!%p80_p3) target bundleno = 26 (0x1a), region = 24  ;;  %s225_s27 = sand.u32 (%p80_p3), 1, %s898_s19  }
   0xd   : > { %s763_s28 = sshll.u32 (%p80_p3), %s906_s21, 2  ;;  %s762_s29 = sshll.u32 (%p80_p3), %s225_s27, 6 }
   0xe   : > { %s987_s7 = scalar_lea.vmem (%p80_p3), %s1070_s1, %s763_s28  ;;  %s227_s8 = scalar_lea.vmem (%p80_p3), [#allocation3], %s762_s29 }
   0xf   : > { %v249_v0 = vld [vmem:[%s987_s7] sm:$0xf] (%p80_p3)  ;;  %v251_v1 = vld [vmem:[%s987_s7 + $0x8] sm:$0xf] (%p80_p3)  ;;  %v253_v2 = vld [vmem:[%s987_s7 + $0x10] sm:$0xf] (%p80_p3) }
  0x10   : > { %250 = vst [vmem:[%s227_s8] sm:$0xf] (%p80_p3), %v249_v0  ;;  %252 = vst [vmem:[%s227_s8 + $0x4] sm:$0xf] (%p80_p3), %v251_v1  ;;  %v255_v3 = vld [vmem:[%s987_s7 + $0x18] sm:$0xf] (%p80_p3) }
  0x11   : > { %v257_v4 = vld [vmem:[%s987_s7 + $0x20] sm:$0xf]  ;;  %254 = vst [vmem:[%s227_s8 + $0x8] sm:$0xf] %v253_v2  ;;  %256 = vst [vmem:[%s227_s8 + $0xc] sm:$0xf] %v255_v3 }
  0x12   : > { %258 = vst [vmem:[%s227_s8 + $0x10] sm:$0xf] %v257_v4  ;;  %v259_v5 = vld [vmem:[%s987_s7 + $0x28] sm:$0xf]  ;;  %v261_v6 = vld [vmem:[%s987_s7 + $0x30] sm:$0xf] }
  0x13   : > { %v263_v7 = vld [vmem:[%s987_s7 + $0x38] sm:$0xf]  ;;  %260 = vst [vmem:[%s227_s8 + $0x14] sm:$0xf] %v259_v5  ;;  %262 = vst [vmem:[%s227_s8 + $0x18] sm:$0xf] %v261_v6 }
  0x14   : > { %264 = vst [vmem:[%s227_s8 + $0x1c] sm:$0xf] %v263_v7  ;;  %v265_v8 = vld [vmem:[%s987_s7 + $0x40] sm:$0xf]  ;;  %v267_v9 = vld [vmem:[%s987_s7 + $0x48] sm:$0xf] }
  0x15   : > { %v269_v10 = vld [vmem:[%s987_s7 + $0x50] sm:$0xf]  ;;  %266 = vst [vmem:[%s227_s8 + $0x20] sm:$0xf] %v265_v8  ;;  %268 = vst [vmem:[%s227_s8 + $0x24] sm:$0xf] %v267_v9 }
  0x16   : > { %270 = vst [vmem:[%s227_s8 + $0x28] sm:$0xf] %v269_v10  ;;  %v271_v11 = vld [vmem:[%s987_s7 + $0x58] sm:$0xf]  ;;  %v273_v12 = vld [vmem:[%s987_s7 + $0x60] sm:$0xf] }
  0x17   : > { %v275_v13 = vld [vmem:[%s987_s7 + $0x68] sm:$0xf]  ;;  %272 = vst [vmem:[%s227_s8 + $0x2c] sm:$0xf] %v271_v11  ;;  %274 = vst [vmem:[%s227_s8 + $0x30] sm:$0xf] %v273_v12 }
  0x18   : > { %276 = vst [vmem:[%s227_s8 + $0x34] sm:$0xf] %v275_v13  ;;  %v277_v14 = vld [vmem:[%s987_s7 + $0x70] sm:$0xf]  ;;  %v279_v15 = vld [vmem:[%s987_s7 + $0x78] sm:$0xf] }
  0x19   : > { %278 = vst [vmem:[%s227_s8 + $0x38] sm:$0xf] %v277_v14  ;;  %280 = vst [vmem:[%s227_s8 + $0x3c] sm:$0xf] %v279_v15 }
  0x1a PF: > { %p764_p6 = scmp.ge.s32.totalorder %s910_s22, 1  ;;  %p353_p7 = scmp.lt.s32.totalorder %s910_s22, 3 }
  0x1c   : > { %p354_p8 = pnand %p764_p6, %p353_p7 }
  0x1d   : > { %p414_p9 = scmp.lt.s32.totalorder (!%p354_p8), %s902_s20, 1  ;;  %s360_s9 = sand.u32 (!%p354_p8), 1, %s894_s18  }
  0x1e   : > { %357 = sbr.rel (%p354_p8) target bundleno = 368 (0x170), region = 77  ;;  %s765_s10 = sshll.u32 (!%p354_p8), %s360_s9, 6 }
  0x1f   : > { %s362_s18 = scalar_lea.vmem (!%p354_p8), [#allocation3], %s765_s10 }
  0x23   : > { %v912_v16 = vmov 0.0   ;;  %vm913_vm0 = vmmov 0   ;;  %s1012_s11 = scalar_select %p414_p9, %s902_s20, 1  ;;  %v856_v17 = vld [vmem:[%s362_s18 + $0x38] sm:$0xff]   ;;  %v857_v18 = vld [vmem:[%s362_s18 + $0x30] sm:$0xff]   ;;  %v858_v19 = vld [vmem:[%s362_s18 + $0x28] sm:$0xff]  }
  0x24   : > { %794 = vmatprep.subr.bf16.mxu0 %v912_v16  ;;  %810 = vmatprep.mubr.msk.bf16.mxu0 %vm913_vm0, %v912_v16  ;;  %v859_v20 = vld [vmem:[%s362_s18 + $0x20] sm:$0xff]   ;;  %v860_v21 = vld [vmem:[%s362_s18 + $0x18] sm:$0xff]   ;;  %v861_v22 = vld [vmem:[%s362_s18 + $0x10] sm:$0xff]  }
  0x25   : > { %s1018_s14 = scalar_lea.vmem %s1071_s2, %s1012_s11  ;;  %s419_s17 = scalar_lea.vmem %s1072_s3, %s1012_s11  ;;  %795 = vmatpush3.bf16.msra.mxu0 %v856_v17  ;;  %v862_v23 = vld [vmem:[%s362_s18 + $0x8] sm:$0xff]   ;;  %v863_v24 = vld [vmem:[%s362_s18] sm:$0xff]   ;;  %v438_v25 = vld [vmem:[%s1069_s0] sm:$0xf] }
  0x26   : > { %s422_s27 = scalar_lea.vmem %s1073_s4, %s1012_s11  ;;  %s766_s28 = sshll.u32 %s1012_s11, 3  ;;  %796 = vmatprep.subr.bf16.mxu0 %v912_v16  ;;  %v776_v31 = vld [vmem:[%s1018_s14] ss:$0 sm:$0xff] (%p414_p9) }
  0x27   : > { %s1032_s6 = scalar_lea.vmem %s1074_s5, %s766_s28 }
  0x29   : > { %797 = vmatpush3.bf16.msra.mxu0 %v857_v18 }
  0x2a   : > { %798 = vmatprep.subr.bf16.mxu0 %v912_v16 }
  0x2d   : > { %799 = vmatpush3.bf16.msra.mxu0 %v858_v19 }
  0x2e   : > { %800 = vmatprep.subr.bf16.mxu0 %v912_v16 }
  0x31   : > { %801 = vmatpush3.bf16.msra.mxu0 %v859_v20 }
  0x32   : > { %802 = vmatprep.subr.bf16.mxu0 %v912_v16 }
  0x35   : > { %803 = vmatpush3.bf16.msra.mxu0 %v860_v21 }
  0x36   : > { %804 = vmatprep.subr.bf16.mxu0 %v912_v16 }
  0x39   : > { %805 = vmatpush3.bf16.msra.mxu0 %v861_v22 }
  0x3a   : > { %806 = vmatprep.subr.bf16.mxu0 %v912_v16 }
  0x3d   : > { %807 = vmatpush3.bf16.msra.mxu0 %v862_v23 }
  0x3e   : > { %808 = vmatprep.subr.bf16.mxu0 %v912_v16 }
  0x41   : > { %809 = vmatpush3.bf16.msra.mxu0 %v863_v24 }
  0x44   : > { %811 = vmatmul.mubr.bf16.vlgmr.msra.gmra.mxu0 %v438_v25 }
 0x104   : > { %v537_v26 = vpop.f32.mrf.mxu0 }
 0x105   : > { %544 = vst [vmem:[#allocation2] sm:$0xff] %v537_v26 }
 0x106   : > { %v812_v27 = vpop.f32.mrf.mxu0  ;;  %549 = sbr.rel (!%p414_p9) target bundleno = 272 (0x110), region = 89 }
 0x108   : > { %v540_v28 = vpop.f32.mrf.mxu0 }
 0x10a   : > { %v813_v29 = vpop.f32.mrf.mxu0 }
 0x10c   : > { %v550_v30 = vld [vmem:[#allocation2] sm:$0xff] }
 0x10d   : > { %v558_v32 = vadd.f32 %v776_v31, %v550_v30 }
 0x10f   : > { %559 = vst [vmem:[%s1032_s6] sm:$0xff] %v558_v32 }
 0x110 PF: > { %p560_p10 = scmp.ge.s32.totalorder %s902_s20, 1 }
 0x111   : > { %v565_v33 = vld [vmem:[#allocation2] sm:$0xff] (%p560_p10) }
 0x112   : > { %564 = sbr.rel (!%p560_p10) target bundleno = 368 (0x170), region = 93  ;;  %v778_v34 = vld [vmem:[%s1018_s14] ss:$0 sm:$0xff] (%p560_p10) }
 0x113   : > { %v779_v35 = vld [vmem:[%s422_s27] ss:$0 sm:$0xff] (%p560_p10)  ;;  %v573_v36 = vadd.f32 (%p560_p10), %v778_v34, %v565_v33 }
 0x114   : > { %v780_v52 = vld [vmem:[%s419_s17] ss:$0 sm:$0xff] (%p560_p10) }
 0x115   : > { %v582_v37 = vsub.f32 (%p560_p10), %v779_v35, %v573_v36 }
 0x117   : > { %v584_v38 = vand.u32 2147483647, %v582_v37  ;;  %v583_v48 = vmax.f32 %v582_v37, 0.0 }
 0x119   : > { %v585_v39 = vsub.f32 0.0, %v584_v38 }
 0x11b   : > { %v586_v40 = vmul.f32 1.442695, %v585_v39 }
 0x11d   : > { %864 = vpow2.f32 %v586_v40 }
 0x12a   : > { %v865_v41 = vpop.eup %864 }
 0x12b   : > { %v588_v42 = vadd.f32 1.0, %v865_v41  ;;  %v591_v43 = vmul.f32 -0.5, %v865_v41  ;;  %v594_v45 = vand.u32 2147483647, %v865_v41 }
 0x12d   : > { %866 = vlog2.f32 %v588_v42  ;;  %v592_v44 = vadd.f32 1.0, %v591_v43  ;;  %vm595_vm1 = vcmp.lt.f32.partialorder %v594_v45, 0.0004427343 }
 0x12f   : > { %v593_v46 = vmul.f32 %v865_v41, %v592_v44 }
 0x13a   : > { %v867_v47 = vpop.eup %866 }
 0x13b   : > { %v590_v49 = vmul.f32 0.6931472, %v867_v47 }
 0x13d   : > { %v596_v50 = vsel %vm595_vm1, %v593_v46, %v590_v49 }
 0x13e   : > { %v597_v51 = vadd.f32 %v596_v50, %v583_v48 }
 0x140   : > { %v598_v53 = vsub.f32 %v779_v35, %v597_v51 }
 0x142   : > { %v605_v54 = vsub.f32 %v598_v53, %v780_v52 }
 0x144   : > { %v607_v55 = vand.u32 2147483647, %v605_v54  ;;  %v606_v1 = vmax.f32 %v605_v54, 0.0 }
 0x146   : > { %v608_v56 = vsub.f32 0.0, %v607_v55 }
 0x148   : > { %v609_v57 = vmul.f32 1.442695, %v608_v56 }
 0x14a   : > { %868 = vpow2.f32 %v609_v57 }
 0x157   : > { %v869_v58 = vpop.eup %868 }
 0x158   : > { %v611_v59 = vadd.f32 1.0, %v869_v58  ;;  %v614_v60 = vmul.f32 -0.5, %v869_v58  ;;  %v617_v62 = vand.u32 2147483647, %v869_v58 }
 0x15a   : > { %870 = vlog2.f32 %v611_v59  ;;  %v615_v61 = vadd.f32 1.0, %v614_v60  ;;  %vm618_vm2 = vcmp.lt.f32.partialorder %v617_v62, 0.0004427343 }
 0x15c   : > { %v616_v63 = vmul.f32 %v869_v58, %v615_v61 }
 0x167   : > { %v871_v0 = vpop.eup %870 }
 0x168   : > { %v613_v2 = vmul.f32 0.6931472, %v871_v0 }
 0x16a   : > { %v619_v3 = vsel %vm618_vm2, %v616_v63, %v613_v2 }
 0x16b   : > { %v620_v4 = vadd.f32 %v619_v3, %v606_v1 }
 0x16d   : > { %v621_v5 = vadd.f32 %v780_v52, %v620_v4 }
 0x16f   : > { %622 = vst [vmem:[%s1032_s6] sm:$0xff] %v621_v5 }
 0x170 PF: > { %s15_s22 = sadd.s32 1, %s910_s22   ;;  %s1075_s18 = smov %s898_s19 }
 0x171   : > { %p12_p11 = scmp.ge.s32.totalorder %s15_s22, 4   ;;  %s1076_s19 = smov %s979_s26 }
 0x172   : > { %s1077_s20 = smov %s906_s21  ;;  %s1078_s21 = smov %s1080_s23 }
 0x173   :  { %14 = sbr.rel (!%p12_p11) target bundleno = 3 (0x3), region = 140 }

</bundles_post_ra>
